<compile_context>
chip_gen: v7x
topology: tpu7x:2x2x1
jax: 0.10.0
libtpu: 0.0.40
codegen_flags: <defaults>
</compile_context>

<pallas_src>
import functools
import math

import jax
import jax.numpy as jnp
import numpy as np
from jax.experimental import pallas as pl
from jax.experimental.pallas import tpu as pltpu

_AL, _AU = 0.01, 10.0
_BL, _BU = 0.01, 10.0
_EPS = 1e-6


def _round_up(v, m):
    return ((v + m - 1) // m) * m


def _kumar_warp_kernel(x_ref, a_ref, b_ref, o_ref, *, eps):
    a = a_ref[...]                                   # [1, Dp] warp exponents
    b = b_ref[...]                                   # [1, Dp]
    # Clamp keeps x strictly inside (0, 1) so the logs below are finite (VPU).
    x = jnp.clip(x_ref[...], eps, 1.0 - eps)         # [tb, Dp]
    # x ** a  (x > 0) and  1 - (1 - t) ** b  via exp/log on the EUP.
    # If t rounds to 1.0, log(1-t) = -inf -> exp = 0 -> out = 1, matching
    # torch's 0 ** b == 0 path.
    t = jnp.exp(a * jnp.log(x))
    out = 1.0 - jnp.exp(b * jnp.log(1.0 - t))
    o_ref[...] = out.astype(o_ref.dtype)


def kumar_warp(x, a_param, b_param, *, block_b=2048):
    """x: [batch, dim] float; a_param, b_param: [dim] raw (pre-sigmoid) params."""
    B, D = x.shape
    x = x.astype(jnp.float32)

    # Warp exponents precomputed once in the wrapper (tiny O(D) params; this is
    # not per-element x work, so it is not the "pre-scale in wrapper" trap).
    a = _AL + (_AU - _AL) * jax.nn.sigmoid(a_param.astype(jnp.float32))
    b = _BL + (_BU - _BL) * jax.nn.sigmoid(b_param.astype(jnp.float32))

    # ---- Lane-dense repack: fold k batch rows into the lane axis so that the
    # packed feature width Dp = k*D is a multiple of 128 (full vst stores). ----
    k = 128 // math.gcd(D, 128)          # smallest k with (k * D) % 128 == 0
    Dp = k * D
    Bk = _round_up(B, k)
    if Bk != B:
        x = jnp.pad(x, ((0, Bk - B), (0, 0)))   # pad rows; clamp makes them benign
    R = Bk // k
    xp = x.reshape(R, Dp)
    ap = jnp.tile(a, k).reshape(1, Dp)
    bp = jnp.tile(b, k).reshape(1, Dp)

    # ---- Row tiling ----
    Rp = _round_up(R, 8)                              # sublane alignment
    bytes_per_row = Dp * 4
    vmem_budget = 12 << 20                            # headroom under v5e's 16 MiB scoped VMEM
    # x + out tiles, each double-buffered -> 4 live tiles of (tb, Dp) f32.
    max_rows = max(8, ((vmem_budget // (4 * bytes_per_row)) // 8) * 8)
    tb = max(8, (min(block_b, max_rows, Rp) // 8) * 8)
    # Guarantee >= 2 grid steps when possible so the "parallel" axis shards
    # across both TensorCores on v7x.
    if Rp // tb < 2 and Rp >= 16:
        tb = max(8, ((Rp // 2) // 8) * 8)
    Rp = _round_up(Rp, tb)                            # no ragged tail block
    if Rp != R:
        xp = jnp.pad(xp, ((0, Rp - R), (0, 0)))
    grid = (Rp // tb,)

    kernel = functools.partial(_kumar_warp_kernel, eps=_EPS)

    out_packed = pl.pallas_call(
        kernel,
        out_shape=jax.ShapeDtypeStruct((Rp, Dp), jnp.float32),
        grid_spec=pltpu.PrefetchScalarGridSpec(
            num_scalar_prefetch=0,
            grid=grid,
            in_specs=[
                pl.BlockSpec((tb, Dp), lambda i: (i, 0)),   # x tile
                pl.BlockSpec((1, Dp), lambda i: (0, 0)),    # warp exponent a (reused)
                pl.BlockSpec((1, Dp), lambda i: (0, 0)),    # warp exponent b (reused)
            ],
            out_specs=pl.BlockSpec((tb, Dp), lambda i: (i, 0)),
        ),
        compiler_params=pltpu.CompilerParams(
            dimension_semantics=("parallel",)),
    )(xp, ap, bp)

    # Undo the padding / lane packing.
    return out_packed[:R].reshape(Bk, D)[:B]


def reference(x, a_param, b_param):
    """Pure-JAX reference mirroring the PyTorch forward."""
    a = _AL + (_AU - _AL) * jax.nn.sigmoid(a_param)
    b = _BL + (_BU - _BL) * jax.nn.sigmoid(b_param)
    xc = jnp.clip(x, _EPS, 1.0 - _EPS)
    return 1.0 - (1.0 - xc ** a) ** b


if __name__ == "__main__":
    # Realistic HEBO-style shape: feature dim < 128 and not lane-aligned, which
    # exercises the lane-dense repack (k = 32 -> packed width 640) and yields a
    # 2-step parallel grid.
    batch, dim = 512, 20

    key = jax.random.PRNGKey(0)
    k_x, k_a, k_b = jax.random.split(key, 3)
    # Warp operates on inputs in [0, 1] (GP input warping).
    x = jax.random.uniform(k_x, (batch, dim), jnp.float32, 0.0, 1.0)
    # Raw parameters (module inits them to zeros; small randoms exercise the math).
    a_param = 0.5 * jax.random.normal(k_a, (dim,), jnp.float32)
    b_param = 0.5 * jax.random.normal(k_b, (dim,), jnp.float32)

    out = jax.block_until_ready(kumar_warp(x, a_param, b_param))

    ref = reference(x, a_param, b_param)
    np.testing.assert_allclose(np.asarray(out), np.asarray(ref),
                               rtol=1e-5, atol=1e-5)
    print("KERNEL_OK")
</pallas_src>

<mosaic_0001>
module attributes {stable_mosaic.version = 11 : i64} {
  func.func @_kumar_warp_kernel(%arg0: i32, %arg1: memref<8x640xf32, #tpu.memory_space<vmem>>, %arg2: memref<1x640xf32, #tpu.memory_space<vmem>>, %arg3: memref<1x640xf32, #tpu.memory_space<vmem>>, %arg4: memref<8x640xf32, #tpu.memory_space<vmem>>) attributes {dimension_semantics = [#tpu.dimension_semantics<parallel>], iteration_bounds = array<i64: 2>, scalar_prefetch = 0 : i64, scratch_operands = 0 : i64, tpu.core_type = #tpu.core_type<tc>, window_params = [{transform_indices = @transform_0, window_bounds = array<i64: 8, 640>}, {pipeline_mode = #tpu.pipeline_mode<synchronous>, transform_indices = @transform_1, window_bounds = array<i64: 1, 640>}, {pipeline_mode = #tpu.pipeline_mode<synchronous>, transform_indices = @transform_2, window_bounds = array<i64: 1, 640>}, {transform_indices = @transform_3, window_bounds = array<i64: 8, 640>}]} {
    %c0 = arith.constant 0 : index
    %c0_0 = arith.constant 0 : index
    %0 = vector.load %arg2[%c0, %c0_0] : memref<1x640xf32, #tpu.memory_space<vmem>>, vector<1x640xf32>
    %c0_1 = arith.constant 0 : index
    %c0_2 = arith.constant 0 : index
    %1 = vector.load %arg3[%c0_1, %c0_2] : memref<1x640xf32, #tpu.memory_space<vmem>>, vector<1x640xf32>
    %c0_3 = arith.constant 0 : index
    %c0_4 = arith.constant 0 : index
    %2 = vector.load %arg1[%c0_3, %c0_4] : memref<8x640xf32, #tpu.memory_space<vmem>>, vector<8x640xf32>
    %cst = arith.constant 9.99999997E-7 : f32
    %cst_5 = arith.constant 0.999998986 : f32
    %3 = vector.broadcast %cst : f32 to vector<8x640xf32>
    %4 = arith.maximumf %3, %2 : vector<8x640xf32>
    %5 = vector.broadcast %cst_5 : f32 to vector<8x640xf32>
    %6 = arith.minimumf %5, %4 : vector<8x640xf32>
    %7 = math.log %6 : vector<8x640xf32>
    %8 = vector.broadcast %0 : vector<1x640xf32> to vector<8x640xf32>
    %9 = arith.mulf %8, %7 : vector<8x640xf32>
    %10 = math.exp %9 : vector<8x640xf32>
    %cst_6 = arith.constant 1.000000e+00 : f32
    %11 = vector.broadcast %cst_6 : f32 to vector<8x640xf32>
    %12 = arith.subf %11, %10 : vector<8x640xf32>
    %13 = math.log %12 : vector<8x640xf32>
    %14 = vector.broadcast %1 : vector<1x640xf32> to vector<8x640xf32>
    %15 = arith.mulf %14, %13 : vector<8x640xf32>
    %16 = math.exp %15 : vector<8x640xf32>
    %cst_7 = arith.constant 1.000000e+00 : f32
    %17 = vector.broadcast %cst_7 : f32 to vector<8x640xf32>
    %18 = arith.subf %17, %16 : vector<8x640xf32>
    %c0_8 = arith.constant 0 : index
    %c0_9 = arith.constant 0 : index
    %19 = vector.load %arg4[%c0_8, %c0_9] : memref<8x640xf32, #tpu.memory_space<vmem>>, vector<8x640xf32>
    tpu.vector_store %arg4[%c0_8, %c0_9], %18 {strides = array<i32>} : memref<8x640xf32, #tpu.memory_space<vmem>>, vector<8x640xf32>,
    return
  }
  func.func @transform_0(%arg0: i32) -> (i32, i32) {
    %c0_i32 = arith.constant 0 : i32
    %c0_i32_0 = arith.constant 0 : i32
    return %arg0, %c0_i32 : i32, i32
  }
  func.func @transform_1(%arg0: i32) -> (i32, i32) {
    %c0_i32 = arith.constant 0 : i32
    %c0_i32_0 = arith.constant 0 : i32
    %c0_i32_1 = arith.constant 0 : i32
    return %c0_i32, %c0_i32_0 : i32, i32
  }
  func.func @transform_2(%arg0: i32) -> (i32, i32) {
    %c0_i32 = arith.constant 0 : i32
    %c0_i32_0 = arith.constant 0 : i32
    %c0_i32_1 = arith.constant 0 : i32
    return %c0_i32, %c0_i32_0 : i32, i32
  }
  func.func @transform_3(%arg0: i32) -> (i32, i32) {
    %c0_i32 = arith.constant 0 : i32
    %c0_i32_0 = arith.constant 0 : i32
    return %arg0, %c0_i32 : i32, i32
  }
}

</mosaic_0001>

<bundles_post_ra>
// kernel: tpu_custom_call.1
= control target key start
LH: loop header
LB: loop body
LE: loop exit
PB: predicated region body
PF: predicated region fallthrough
CT: control target
= control target key end

     0   :  { %8 = vsyncpa [#allocation3], 0  ;;  %s908_s0 = inlined_call_operand.hbm [shape: f32[16,640], index: 0, kind: input, shape index: {}]   ;;  %s909_s1 = inlined_call_operand.hbm [shape: f32[1,640], index: 1, kind: input, shape index: {}]   ;;  %s910_s2 = inlined_call_operand.vmem [shape: f32[1,640], index: 2, kind: input, shape index: {}]   ;;  %s911_s3 = inlined_call_operand.hbm [shape: f32[16,640], index: 3, kind: output, shape index: {}]  }
   0x1   :  { %10 = vsyncpa [#allocation3 + $0x1], 0 }
   0x2   :  { %11 = vsyncpa [#allocation6], 0 }
   0x3   :  { %12 = vsyncpa [#allocation4], 0 }
   0x4   :  { %14 = vsyncpa [#allocation4 + $0x1], 0  ;;  %s693_s12 = smov 0   ;;  %s695_s13 = smov 0  }
   0x5   :  { %s697_s14 = smov 0   ;;  %s699_s15 = smov 0  }
   0x6 LB: > { %s714_s16 = sadd.s32 4294967295, %s668_s15   ;;  %s429_s17 = sadd.s32 4294967294, %s668_s15   ;;  %s668_s15 = sphi %s699_s15, %s935_s15   ;;  %s664_s14 = sphi %s697_s14, %s934_s14   ;;  %s660_s13 = sphi %s695_s13, %s933_s13   ;;  %s656_s12 = sphi %s693_s12, %s932_s12  }
   0x7   : > { %p40_p0 = scmp.ne.s32.totalorder %s660_s13, %s656_s12  ;;  %p912_p1 = scmp.eq.s32.totalorder %s714_s16, 0 }
   0x8   : > { %p112_p3 = scmp.eq.s32.totalorder %s429_s17, 1  ;;  %p430_p5 = scmp.ge.s32.totalorder %s668_s15, 1 }
   0x9   : > { %p723_p4 = por %p912_p1, %p40_p0  ;;  %p119_p7 = scmp.lt.s32.totalorder %s668_s15, 3 }
   0xa   : > { %p728_p6 = por %p112_p3, %p40_p0  ;;  %s670_s21 = smov [#allocation5]  }
   0xb   : > { %s915_s18 = scalar_select %p723_p4, 1, 0 }
   0xc   : > { %s916_s19 = scalar_select %p728_p6, 1, 0 }
   0xd   : > { %p733_p8 = pnand %p430_p5, %p119_p7  ;;  %s132_s22 = sshll.u32 %s670_s21, 4  ;;  %s133_s22 = int_to_ptr.vmem [resolvable:$true] %s132_s22 }
   0xe   : > { %s741_s23 = sadd.s32 1, %s668_s15   ;;  %s27_s27 = sadd.s32 1, %s664_s14 }
   0xf   : > { %s917_s20 = scalar_select %p733_p8, 1, 0 }
  0x10   : > { %p451_p10 = pneg %p733_p8  ;;  %s24_s25 = ssub.s32 %s668_s15, %s741_s23 }
  0x11   : > { %p751_p12 = scmp.eq.s32.totalorder %s24_s25, 0  ;;  %s540_s30 = scalar_lea.hbm %s909_s1, 80 }
  0x12   : > { %p745_p11 = pnand %p451_p10, %p912_p1  ;;  %p541_p0 = scmp.ne.s32.totalorder %s909_s1, %s540_s30 }
  0x13   : > { %s919_s26 = scalar_select %p751_p12, 1, 0 }
  0x14   : > { %p542_p3 = pneg %p745_p11  ;;  %p547_p10 = scmp.lt.u32.totalorder %s540_s30, %s909_s1 }
  0x16   : > { %p543_p5 = pnand %p542_p3, %p541_p0 }
  0x18   : > { %p544_p7 = pneg %p543_p5 }
  0x1a   : > { %p549_p9 = pnand %p547_p10, %p544_p7 }
  0x1c   : > { %552 = shalt.err (!%p549_p9)
}
  0x1d   : > { %s553_s8 = scalar_lea.vmem %s133_s22, 80  ;;  %s560_s9 = scalar_lea.vmem %s133_s22, 96 }
  0x1e   : > { %p554_p1 = scmp.ne.s32.totalorder %s133_s22, %s553_s8  ;;  %p561_p6 = scmp.lt.s32.totalorder %s133_s22, %s133_s22 }
  0x1f   : > { %p562_p4 = scmp.lt.s32.totalorder %s560_s9, %s553_s8 }
  0x20   : > { %p556_p2 = pnand %p554_p1, %p542_p3 }
  0x21   : > { %p563_p8 = por %p562_p4, %p561_p6 }
  0x22   : > { %p557_p13 = pneg %p556_p2 }
  0x24   : > { %p564_p12 = pnand %p563_p8, %p557_p13 }
  0x26   : > { %567 = shalt.err (!%p564_p12)
}
  0x27   : > { %454 = dma.hbm_to_vmem [thread:$0]  (!%p745_p11), %s909_s1, 80, %s133_s22, [#allocation6]  }
  0x28   : > { %p920_p1 = scmp.ne.s32.totalorder %s919_s26, 0  ;;  %p35_p2 = scmp.eq.s32.totalorder %s668_s15, 0 }
  0x29   : > { %p921_p4 = scmp.ne.s32.totalorder %s664_s14, %s660_s13  ;;  %p922_p6 = scmp.eq.s32.totalorder %s714_s16, 1 }
  0x2a   : > { %s777_s17 = scalar_select %p920_p1, %s664_s14, %s27_s27  }
  0x2b   : > { %p785_p8 = por %p922_p6, %p921_p4  ;;  %p464_p9 = scmp.lt.s32.totalorder %s668_s15, 2 }
  0x2c   : > { %s146_s24 = sand.u32 1, %s664_s14   ;;  %p924_p12 = pmov %p921_p4 }
  0x2d   : > { %s439_s25 = smul.u32 40, %s146_s24  ;;  %s147_s5 = scalar_lea.sflag [#allocation3], %s146_s24 }
  0x2e   : > { %p36_p13 = por %p35_p2, %p924_p12  ;;  %s440_s28 = smul.u32 640, %s668_s15 }
  0x2f   : > { %s150_s30 = scalar_lea.vmem [#allocation2], %s439_s25  ;;  %s573_s9 = scalar_lea.hbm %s908_s0, 1280 }
  0x30   : > { %p795_p0 = pnand %p464_p9, %p36_p13  ;;  %s802_s27 = scalar_lea.hbm %s908_s0, %s440_s28 }
  0x31   : > { %s158_s4 = sshll.u32 %s150_s30, 4  ;;  %s568_s6 = scalar_lea.hbm %s802_s27, 640  ;;  %s804_s4 = int_to_ptr.vmem [resolvable:$true] %s158_s4 }
  0x32   : > { %p569_p11 = scmp.ne.s32.totalorder %s802_s27, %s568_s6  ;;  %p570_p3 = pneg %p795_p0 }
  0x33   : > { %p574_p10 = scmp.lt.u32.totalorder %s802_s27, %s908_s0  ;;  %p575_p1 = scmp.lt.u32.totalorder %s573_s9, %s568_s6 }
  0x34   : > { %p571_p5 = pnand %p570_p3, %p569_p11  ;;  %p577_p4 = scmp.lt.u32.totalorder %s568_s6, %s802_s27 }
  0x35   : > { %p576_p2 = por %p575_p1, %p574_p10 }
  0x36   : > { %p572_p7 = pneg %p571_p5 }
  0x37   : > { %p578_p6 = por %p577_p4, %p576_p2 }
  0x39   : > { %p579_p9 = pnand %p578_p6, %p572_p7 }
  0x3b   : > { %582 = shalt.err (!%p579_p9)
}
  0x3c   : > { %s583_s24 = scalar_lea.vmem %s804_s4, 640  ;;  %s671_s25 = smov [#allocation2]  }
  0x3d   : > { %p584_p12 = scmp.ne.s32.totalorder %s804_s4, %s583_s24  ;;  %s588_s28 = sshll.u32 %s671_s25, 4  ;;  %s589_s28 = int_to_ptr.vmem [resolvable:$false] %s588_s28 }
  0x3e   : > { %s590_s22 = scalar_lea.vmem %s589_s28, 1280  ;;  %p591_p5 = scmp.lt.s32.totalorder %s804_s4, %s589_s28 }
  0x3f   : > { %p586_p13 = pnand %p584_p12, %p570_p3  ;;  %p592_p10 = scmp.lt.s32.totalorder %s590_s22, %s583_s24 }
  0x41   : > { %p587_p11 = pneg %p586_p13  ;;  %p593_p1 = por %p592_p10, %p591_p5 }
  0x43   : > { %p594_p2 = pnand %p593_p1, %p587_p11 }
  0x45   : > { %597 = shalt.err (!%p594_p2)
}
  0x46   : > { %458 = dma.hbm_to_vmem [thread:$0]  (!%p795_p0), %s802_s27, 640, %s804_s4, %s147_s5  }
  0x47   : > { %p926_p7 = scmp.ne.s32.totalorder %s917_s20, 0 }
  0x48   : > { %s834_s26 = sand.u32 (!%p926_p7), 1, %s660_s13   ;;  %p927_p3 = scmp.ne.s32.totalorder (!%p926_p7), %s915_s18, 0 }
  0x49   : > { %167 = sbr.rel (%p926_p7) target bundleno = 167 (0xa7), region = 32  ;;  %s170_s6 = scalar_lea.sflag (!%p926_p7), [#allocation3], %s834_s26 }
  0x4a   : > { %s441_s30 = smul.u32 (!%p926_p7), 40, %s834_s26 }
  0x4c   : > { %s173_s7 = scalar_lea.vmem (!%p926_p7), [#allocation2], %s441_s30 }
  0x50   : > { %643 = dma.done.wait (%p927_p3), %s170_s6, 640  }
  0x51   : > { %645 = vsyncadd (%p927_p3), %s170_s6, 4294966656  ;;  %p928_p0 = scmp.eq.s32.totalorder %s714_s16, 0 }
  0x53   : > { %647 = dma.done.wait (%p928_p0), [#allocation6], 80   ;;  %p929_p4 = pmov %p928_p0 }
  0x54   : > { %v202_v0 = vld [vmem:[%s173_s7] sm:$0xff]  ;;  %v203_v2 = vld [vmem:[%s173_s7 + $0x8] sm:$0xff]  ;;  %v204_v3 = vld [vmem:[%s173_s7 + $0x10] sm:$0xff]  ;;  %v228_v5 = vlaneseq  ;;  %s442_s29 = smul.u32 640, %s714_s16  ;;  %s199_s27 = scalar_lea.vmem [#allocation7], %s441_s30 }
  0x55   : > { %649 = vsyncadd (%p929_p4), [#allocation6], 4294967216  ;;  %v207_v1 = vmax.f32 %v202_v0, 1e-06  ;;  %v205_v4 = vld [vmem:[%s173_s7 + $0x18] sm:$0xff]  ;;  %v206_v8 = vld [vmem:[%s173_s7 + $0x20] sm:$0xff] }
  0x56   : > { %v208_v6 = vmax.f32 %v203_v2, 1e-06  ;;  %v209_v7 = vmax.f32 %v204_v3, 1e-06  ;;  %v210_v10 = vmax.f32 %v205_v4, 1e-06  ;;  %s866_s8 = scalar_lea.hbm %s911_s3, %s442_s29 }
  0x57   : > { %v212_v9 = vmin.f32 %v207_v1, 0.999999  ;;  %v211_v13 = vmax.f32 %v206_v8, 1e-06  ;;  %v848_v15 = vshrl.u32 %v228_v5, 7  ;;  %s349_s4 = sshll.u32 %s199_s27, 4  ;;  %s861_s4 = int_to_ptr.vmem [resolvable:$true] %s349_s4 }
  0x58   : > { %v213_v11 = vmin.f32 %v208_v6, 0.999999  ;;  %v214_v12 = vmin.f32 %v209_v7, 0.999999  ;;  %v215_v14 = vmin.f32 %v210_v10, 0.999999 }
  0x59   : > { %500 = vlog2.f32 %v212_v9  ;;  %v216_v16 = vmin.f32 %v211_v13, 0.999999  ;;  %v230_v17 = vsub.s32 0, %v848_v15  ;;  %v200_v18 = vld [vmem:[#allocation5] sm:$0x1f]  ;;  %v234_v19 = vsub.s32 1, %v848_v15 }
  0x5a   : > { %502 = vlog2.f32 %v213_v11  ;;  %v238_v20 = vsub.s32 2, %v848_v15  ;;  %v242_v21 = vsub.s32 3, %v848_v15  ;;  %v246_v23 = vsub.s32 4, %v848_v15  ;;  %v201_v58 = vld [vmem:[%s910_s2] sm:$0x1f]  ;;  %s335_s9 = scalar_lea.sflag [#allocation4], %s834_s26 }
  0x5b   : > { %504 = vlog2.f32 %v214_v12  ;;  %v231_v22 = vrot.slane %v200_v18, %v230_v17  ;;  %v235_v25 = vrot.slane %v200_v18, %v234_v19  ;;  %v287_v59 = vrot.slane %v201_v58, %v230_v17  ;;  %s598_s10 = scalar_lea.vmem %s861_s4, 640  ;;  %s672_s11 = smov [#allocation7]  }
  0x5c   : > { %506 = vlog2.f32 %v215_v14  ;;  %v239_v28 = vrot.slane %v200_v18, %v238_v20  ;;  %v243_v31 = vrot.slane %v200_v18, %v242_v21  ;;  %v247_v35 = vrot.slane %v200_v18, %v246_v23  ;;  %p599_p6 = scmp.ne.s32.totalorder %s861_s4, %s598_s10  ;;  %s602_s24 = sshll.u32 %s672_s11, 4  ;;  %s603_s24 = int_to_ptr.vmem [resolvable:$false] %s602_s24 }
  0x5d   : > { %508 = vlog2.f32 %v216_v16  ;;  %v291_v61 = vrot.slane %v201_v58, %v234_v19  ;;  %v295_v0 = vrot.slane %v201_v58, %v238_v20  ;;  %v299_v3 = vrot.slane %v201_v58, %v242_v21  ;;  %s604_s25 = scalar_lea.vmem %s603_s24, 1280  ;;  %p605_p13 = scmp.lt.s32.totalorder %s861_s4, %s603_s24 }
  0x5e   : > { %v303_v7 = vrot.slane %v201_v58, %v246_v23  ;;  %p600_p9 = pnand %p599_p6, %p785_p8  ;;  %p606_p11 = scmp.lt.s32.totalorder %s604_s25, %s598_s10 }
  0x60   : > { %p601_p12 = pneg %p600_p9  ;;  %p607_p5 = por %p606_p11, %p605_p13 }
  0x62   : > { %p608_p10 = pnand %p607_p5, %p601_p12 }
  0x63   : > { %v501_v24 = vpop.eup %500 }
  0x64   : > { %v503_v26 = vpop.eup %502  ;;  %v218_v27 = vmul.f32 0.6931472, %v501_v24 }
  0x65   : > { %v505_v29 = vpop.eup %504  ;;  %v220_v30 = vmul.f32 0.6931472, %v503_v26 }
  0x66   : > { %v507_v32 = vpop.eup %506  ;;  %v253_v33 = vmul.f32 %v231_v22, %v218_v27  ;;  %v222_v34 = vmul.f32 0.6931472, %v505_v29 }
  0x67   : > { %v509_v36 = vpop.eup %508  ;;  %v254_v37 = vmul.f32 %v235_v25, %v220_v30  ;;  %v224_v38 = vmul.f32 0.6931472, %v507_v32 }
  0x68   : > { %v258_v39 = vmul.f32 1.442695, %v253_v33  ;;  %v255_v40 = vmul.f32 %v239_v28, %v222_v34  ;;  %v226_v41 = vmul.f32 0.6931472, %v509_v36 }
  0x69   : > { %v260_v42 = vmul.f32 1.442695, %v254_v37  ;;  %v256_v43 = vmul.f32 %v243_v31, %v224_v38 }
  0x6a   : > { %510 = vpow2.f32 %v258_v39  ;;  %v262_v44 = vmul.f32 1.442695, %v255_v40  ;;  %v257_v45 = vmul.f32 %v247_v35, %v226_v41 }
  0x6b   : > { %512 = vpow2.f32 %v260_v42  ;;  %v264_v46 = vmul.f32 1.442695, %v256_v43 }
  0x6c   : > { %514 = vpow2.f32 %v262_v44  ;;  %v266_v47 = vmul.f32 1.442695, %v257_v45 }
  0x6d   : > { %516 = vpow2.f32 %v264_v46 }
  0x6e   : > { %518 = vpow2.f32 %v266_v47 }
  0x74   : > { %v511_v48 = vpop.eup %510 }
  0x75   : > { %v513_v49 = vpop.eup %512  ;;  %v268_v50 = vsub.f32 1.0, %v511_v48 }
  0x76   : > { %v515_v51 = vpop.eup %514  ;;  %v269_v52 = vsub.f32 1.0, %v513_v49 }
  0x77   : > { %v517_v53 = vpop.eup %516  ;;  %520 = vlog2.f32 %v268_v50  ;;  %v270_v54 = vsub.f32 1.0, %v515_v51 }
  0x78   : > { %v519_v55 = vpop.eup %518  ;;  %522 = vlog2.f32 %v269_v52  ;;  %v271_v56 = vsub.f32 1.0, %v517_v53 }
  0x79   : > { %524 = vlog2.f32 %v270_v54  ;;  %v272_v57 = vsub.f32 1.0, %v519_v55 }
  0x7a   : > { %526 = vlog2.f32 %v271_v56 }
  0x7b   : > { %528 = vlog2.f32 %v272_v57 }
  0x81   : > { %v521_v60 = vpop.eup %520 }
  0x82   : > { %v523_v62 = vpop.eup %522  ;;  %v274_v63 = vmul.f32 0.6931472, %v521_v60 }
  0x83   : > { %v525_v1 = vpop.eup %524  ;;  %v276_v2 = vmul.f32 0.6931472, %v523_v62 }
  0x84   : > { %v527_v4 = vpop.eup %526  ;;  %v309_v5 = vmul.f32 %v287_v59, %v274_v63  ;;  %v278_v6 = vmul.f32 0.6931472, %v525_v1 }
  0x85   : > { %v529_v8 = vpop.eup %528  ;;  %v310_v9 = vmul.f32 %v291_v61, %v276_v2  ;;  %v280_v10 = vmul.f32 0.6931472, %v527_v4 }
  0x86   : > { %v314_v11 = vmul.f32 1.442695, %v309_v5  ;;  %v311_v12 = vmul.f32 %v295_v0, %v278_v6  ;;  %v282_v13 = vmul.f32 0.6931472, %v529_v8 }
  0x87   : > { %v316_v14 = vmul.f32 1.442695, %v310_v9  ;;  %v312_v15 = vmul.f32 %v299_v3, %v280_v10 }
  0x88   : > { %530 = vpow2.f32 %v314_v11  ;;  %v318_v16 = vmul.f32 1.442695, %v311_v12  ;;  %v313_v17 = vmul.f32 %v303_v7, %v282_v13 }
  0x89   : > { %532 = vpow2.f32 %v316_v14  ;;  %v320_v18 = vmul.f32 1.442695, %v312_v15 }
  0x8a   : > { %534 = vpow2.f32 %v318_v16  ;;  %v322_v19 = vmul.f32 1.442695, %v313_v17 }
  0x8b   : > { %536 = vpow2.f32 %v320_v18 }
  0x8c   : > { %538 = vpow2.f32 %v322_v19 }
  0x92   : > { %v531_v20 = vpop.eup %530 }
  0x93   : > { %v533_v21 = vpop.eup %532  ;;  %v324_v22 = vsub.f32 1.0, %v531_v20 }
  0x94   : > { %v535_v23 = vpop.eup %534  ;;  %v325_v24 = vsub.f32 1.0, %v533_v21 }
  0x95   : > { %v537_v25 = vpop.eup %536  ;;  %329 = vst [vmem:[%s199_s27] sm:$0xff] %v324_v22  ;;  %v326_v26 = vsub.f32 1.0, %v535_v23 }
  0x96   : > { %v539_v27 = vpop.eup %538  ;;  %330 = vst [vmem:[%s199_s27 + $0x8] sm:$0xff] %v325_v24  ;;  %v327_v28 = vsub.f32 1.0, %v537_v25 }
  0x97   : > { %331 = vst [vmem:[%s199_s27 + $0x10] sm:$0xff] %v326_v26  ;;  %v328_v29 = vsub.f32 1.0, %v539_v27 }
  0x98   : > { %332 = vst [vmem:[%s199_s27 + $0x18] sm:$0xff] %v327_v28 }
  0x99   : > { %333 = vst [vmem:[%s199_s27 + $0x20] sm:$0xff] %v328_v29 }
  0x9a   : > { %611 = shalt.err (!%p608_p10)
}
  0x9b   : > { %s612_s28 = scalar_lea.hbm %s866_s8, 640  ;;  %s616_s30 = scalar_lea.hbm %s911_s3, 1280 }
  0x9c   : > { %p613_p1 = scmp.ne.s32.totalorder %s866_s8, %s612_s28  ;;  %p617_p3 = scmp.lt.u32.totalorder %s866_s8, %s911_s3 }
  0x9d   : > { %p618_p0 = scmp.lt.u32.totalorder %s616_s30, %s612_s28  ;;  %p620_p6 = scmp.lt.u32.totalorder %s612_s28, %s866_s8 }
  0x9e   : > { %p614_p2 = pnand %p613_p1, %p785_p8 }
  0x9f   : > { %p619_p4 = por %p618_p0, %p617_p3 }
  0xa0   : > { %p615_p7 = pneg %p614_p2 }
  0xa1   : > { %p621_p9 = por %p620_p6, %p619_p4 }
  0xa3   : > { %p622_p12 = pnand %p621_p9, %p615_p7 }
  0xa5   : > { %625 = shalt.err (!%p622_p12)
}
  0xa6   : > { %449 = dma.vmem_to_hbm [thread:$0]  (%p785_p8), %s861_s4, 640, %s866_s8, %s335_s9  }
  0xa7 PF: > { %s361_s18 = sand.u32 1, %s656_s12   ;;  %p930_p13 = scmp.ne.s32.totalorder %s916_s19, 0 }
  0xa8   : > { %p931_p11 = scmp.ge.s32.totalorder %s668_s15, 2  ;;  %s362_s20 = scalar_lea.sflag [#allocation4], %s361_s18 }
  0xaa   : > { %p460_p5 = pnand %p931_p11, %p930_p13 }
  0xac   : > { %651 = dma.done.wait (!%p460_p5), %s362_s20, 640  }
  0xad   : > { %653 = vsyncadd (!%p460_p5), %s362_s20, 4294966656  ;;  %p17_p10 = scmp.ge.s32.totalorder %s741_s23, 4   ;;  %s932_s12 = smov %s660_s13 }
  0xae   : > { %s933_s13 = smov %s664_s14  ;;  %s934_s14 = smov %s777_s17 }
  0xaf   : > { %s935_s15 = smov %s741_s23  ;;  %19 = sbr.rel (!%p17_p10) target bundleno = 6 (0x6), region = 81 }
  0xb6   :  { %367 = vsyncpa [#allocation3], 1 }
  0xb7   :  { %369 = vsyncpa [#allocation3 + $0x1], 1 }
  0xb8   :  { %370 = vsyncpa [#allocation6], 1 }
  0xb9   :  { %371 = vsyncpa [#allocation4], 1 }
  0xba   :  { %373 = vsyncpa [#allocation4 + $0x1], 1 }

</bundles_post_ra>
